<compile_context>
chip_gen: v7x
topology: tpu7x:2x2x1
jax: 0.10.0
libtpu: 0.0.40
codegen_flags: <defaults>
</compile_context>

<pallas_src>
import functools

import jax
import jax.numpy as jnp
from jax.experimental import pallas as pl
from jax.experimental.pallas import tpu as pltpu


def _qkv_attention_kernel(x_ref, w_ref, b_ref, r_ref, rt_ref, c_ref, o_ref, *, he):
    """One row tile (tn, E) -> (tn, E).

    Index convention for the expanded lane axis j = h*E + g*D + d:
      QE[n, j] = q[n, h, d],  KE[n, j] = k[n, g, d],  VE[n, j] = v[n, g, d].
    """
    x = x_ref[...].astype(w_ref.dtype)  # bf16 (or f32) operand for the MXU

    # Single fused projection + head expansion: (tn, E) @ (E, 3*H*E), f32 accum.
    qkv = jnp.dot(x, w_ref[...], preferred_element_type=jnp.float32) + b_ref[...]
    qe = qkv[:, 0 * he:1 * he]
    ke = qkv[:, 1 * he:2 * he]
    ve = qkv[:, 2 * he:3 * he]

    # s[n, (h,g,d)] = q[n,h,d] * k[n,g,d]   (full-lane-width VPU multiply)
    s = qe * ke
    # att[n, (h,g)] = sum_d s[n, (h,g,d)]   -- segment sum done on the MXU
    att = jnp.dot(s, r_ref[...], preferred_element_type=jnp.float32)      # (tn, H*H)
    # Broadcast att back to the (h,g,d) lane layout (MXU again, R^T is 0/1).
    att_e = jnp.dot(att, rt_ref[...], preferred_element_type=jnp.float32)  # (tn, H*E)
    # w[n, (h,g,d)] = att[n,h,g] * v[n,g,d]
    w = att_e * ve
    # out[n, h*D+d] = sum_g w[n, (h,g,d)]   -- final segment sum on the MXU.
    out = jnp.dot(w, c_ref[...], preferred_element_type=jnp.float32)       # (tn, E)

    # NOTE: when E < 128 this store is lane-masked; that's inherent to the
    # (N, E) output layout of the module and cheap relative to the matmuls.
    o_ref[...] = out.astype(o_ref.dtype)


def fuse_qkv_params(params, num_heads, proj_dtype=jnp.bfloat16):
    """Precompute (ONCE, outside the hot path) the fused/expanded projection
    weight, fused bias, and the constant 0/1 segment-sum matrices."""
    E = params["wq"].shape[0]
    H = num_heads
    assert E % H == 0, "embed_dim must be divisible by num_heads"
    D = E // H
    HE = H * E

    j = jnp.arange(HE)
    h, r = j // E, j % E
    g, d = r // D, r % D
    q_idx = h * D + d            # which q-feature feeds expanded slot (h, g, d)
    k_idx = g * D + d            # which k/v-feature feeds expanded slot (h, g, d)

    wq_t, wk_t, wv_t = params["wq"].T, params["wk"].T, params["wv"].T
    # Column gathers only -- exact (no matmul/rounding) replication of columns.
    w_big = jnp.concatenate(
        [wq_t[:, q_idx], wk_t[:, k_idx], wv_t[:, k_idx]], axis=1
    ).astype(proj_dtype)                                           # (E, 3*H*E)
    b_big = jnp.concatenate(
        [params["bq"][q_idx], params["bk"][k_idx], params["bv"][k_idx]]
    ).reshape(1, 3 * HE).astype(jnp.float32)                       # (1, 3*H*E)

    f32 = jnp.float32
    r_mat = ((h * H + g)[:, None] == jnp.arange(H * H)[None, :]).astype(f32)  # (HE, H*H)
    c_mat = ((h * D + d)[:, None] == jnp.arange(E)[None, :]).astype(f32)      # (HE, E)

    return {"w": w_big, "b": b_big, "r": r_mat, "rt": r_mat.T, "c": c_mat,
            "embed_dim": E, "num_heads": H}


def _round_up(a, m):
    return (a + m - 1) // m * m


def qkv_attention_pallas(x, fused, *, row_tile=512,
                         vmem_limit_bytes=48 * 1024 * 1024):
    """x: (B, S, E) float32.  fused: output of fuse_qkv_params.
    Returns (B, S, E), matching QKVAttention.forward."""
    B, S, E = x.shape
    assert E == fused["embed_dim"]
    H = fused["num_heads"]
    HE = H * E

    N = B * S
    # Largest row tile (multiple of 8) <= row_tile; pad instead of asserting.
    tn = min(row_tile, _round_up(N, 8))
    if _round_up(N, tn) // tn < 2 and tn > 8:
        tn = max(8, _round_up(tn // 2, 8))   # keep >=2 grid steps (v7x megacore)
    n_pad = _round_up(N, tn)

    x2 = x.reshape(N, E)
    if n_pad != N:
        x2 = jnp.pad(x2, ((0, n_pad - N), (0, 0)))

    kernel = functools.partial(_qkv_attention_kernel, he=HE)

    row_spec = pl.BlockSpec((tn, E), lambda i: (i, 0))

    def const(shape):                          # VMEM-resident across the grid
        return pl.BlockSpec(shape, lambda i: (0, 0))

    out2 = pl.pallas_call(
        kernel,
        out_shape=jax.ShapeDtypeStruct((n_pad, E), x.dtype),
        grid_spec=pltpu.PrefetchScalarGridSpec(
            num_scalar_prefetch=0,
            grid=(n_pad // tn,),
            in_specs=[
                row_spec,                 # x rows
                const((E, 3 * HE)),       # fused + head-expanded projection weight
                const((1, 3 * HE)),       # fused bias
                const((HE, H * H)),       # R   : segment-sum  (h,g,d) -> (h,g)
                const((H * H, HE)),       # R^T : broadcast    (h,g)   -> (h,g,d)
                const((HE, E)),           # C   : segment-sum  (h,g,d) -> (h,d)
            ],
            out_specs=row_spec,
        ),
        compiler_params=pltpu.CompilerParams(
            dimension_semantics=("parallel",),
            vmem_limit_bytes=vmem_limit_bytes,
        ),
    )(x2, fused["w"], fused["b"], fused["r"], fused["rt"], fused["c"])

    return out2[:N].reshape(B, S, E)


def qkv_attention_reference(x, params, num_heads, proj_dtype=jnp.float32):
    """Pure-JAX transcription of the PyTorch forward, for verification."""
    B, S, E = x.shape
    D = E // num_heads
    hi = jax.lax.Precision.HIGHEST
    xp = x.astype(proj_dtype)
    q = jnp.dot(xp, params["wq"].T.astype(proj_dtype), precision=hi,
                preferred_element_type=jnp.float32) + params["bq"]
    k = jnp.dot(xp, params["wk"].T.astype(proj_dtype), precision=hi,
                preferred_element_type=jnp.float32) + params["bk"]
    v = jnp.dot(xp, params["wv"].T.astype(proj_dtype), precision=hi,
                preferred_element_type=jnp.float32) + params["bv"]
    q = q.reshape(B, S, num_heads, D)
    k = k.reshape(B, S, num_heads, D)
    v = v.reshape(B, S, num_heads, D)
    att = jnp.einsum("bshd,bsgd->bshg", q, k, precision=hi)   # q @ k.permute(0,1,3,2)
    out = jnp.einsum("bshg,bsgd->bshd", att, v, precision=hi)  # att @ v
    return out.reshape(B, S, E)


def init_params(key, embed_dim):
    """Deterministic synthetic init (shapes follow nn.Linear(embed_dim, embed_dim))."""
    ks = jax.random.split(key, 6)
    scale = 1.0 / jnp.sqrt(embed_dim)
    return {
        "wq": jax.random.uniform(ks[0], (embed_dim, embed_dim), jnp.float32, -scale, scale),
        "bq": jax.random.uniform(ks[1], (embed_dim,), jnp.float32, -scale, scale),
        "wk": jax.random.uniform(ks[2], (embed_dim, embed_dim), jnp.float32, -scale, scale),
        "bk": jax.random.uniform(ks[3], (embed_dim,), jnp.float32, -scale, scale),
        "wv": jax.random.uniform(ks[4], (embed_dim, embed_dim), jnp.float32, -scale, scale),
        "bv": jax.random.uniform(ks[5], (embed_dim,), jnp.float32, -scale, scale),
    }


if __name__ == "__main__":
    B, S, E, H = 2, 64, 32, 4   # embed_dim=32, num_heads=4 -> head_dim=8, H*E=128

    key = jax.random.PRNGKey(0)
    kx, kp = jax.random.split(key)
    x = jax.random.normal(kx, (B, S, E), jnp.float32)
    params = init_params(kp, E)

    ref_f32 = qkv_attention_reference(x, params, H)
    ref_bf16 = qkv_attention_reference(x, params, H, proj_dtype=jnp.bfloat16)

    # Default fast path: bf16 projection on the MXU, f32 accumulation everywhere.
    fused_bf16 = fuse_qkv_params(params, H, proj_dtype=jnp.bfloat16)
    out_bf16 = jax.block_until_ready(qkv_attention_pallas(x, fused_bf16))
    assert out_bf16.shape == (B, S, E)
    assert jnp.allclose(out_bf16, ref_bf16, rtol=1e-2, atol=1e-1), \
        f"bf16 path max abs err {float(jnp.max(jnp.abs(out_bf16 - ref_bf16)))}"
    assert jnp.allclose(out_bf16, ref_f32, rtol=5e-2, atol=5e-1), \
        f"bf16 vs f32 reference max abs err {float(jnp.max(jnp.abs(out_bf16 - ref_f32)))}"

    # Bit-faithful path: keep the projection in f32 (flag per review).
    fused_f32 = fuse_qkv_params(params, H, proj_dtype=jnp.float32)
    out_f32 = jax.block_until_ready(qkv_attention_pallas(x, fused_f32))
    assert jnp.allclose(out_f32, ref_f32, rtol=1e-2, atol=1e-1), \
        f"f32 path max abs err {float(jnp.max(jnp.abs(out_f32 - ref_f32)))}"

    print("KERNEL_OK")
</pallas_src>

<mosaic_0001>
module attributes {stable_mosaic.version = 11 : i64} {
  func.func @_qkv_attention_kernel(%arg0: i32, %arg1: memref<64x32xf32, #tpu.memory_space<vmem>>, %arg2: memref<32x384xbf16, #tpu.memory_space<vmem>>, %arg3: memref<1x384xf32, #tpu.memory_space<vmem>>, %arg4: memref<128x16xf32, #tpu.memory_space<vmem>>, %arg5: memref<16x128xf32, #tpu.memory_space<vmem>>, %arg6: memref<128x32xf32, #tpu.memory_space<vmem>>, %arg7: memref<64x32xf32, #tpu.memory_space<vmem>>) attributes {dimension_semantics = [#tpu.dimension_semantics<parallel>], iteration_bounds = array<i64: 2>, scalar_prefetch = 0 : i64, scratch_operands = 0 : i64, tpu.core_type = #tpu.core_type<tc>, window_params = [{transform_indices = @transform_0, window_bounds = array<i64: 64, 32>}, {pipeline_mode = #tpu.pipeline_mode<synchronous>, transform_indices = @transform_1, window_bounds = array<i64: 32, 384>}, {pipeline_mode = #tpu.pipeline_mode<synchronous>, transform_indices = @transform_2, window_bounds = array<i64: 1, 384>}, {pipeline_mode = #tpu.pipeline_mode<synchronous>, transform_indices = @transform_3, window_bounds = array<i64: 128, 16>}, {pipeline_mode = #tpu.pipeline_mode<synchronous>, transform_indices = @transform_4, window_bounds = array<i64: 16, 128>}, {pipeline_mode = #tpu.pipeline_mode<synchronous>, transform_indices = @transform_5, window_bounds = array<i64: 128, 32>}, {transform_indices = @transform_6, window_bounds = array<i64: 64, 32>}]} {
    %c0 = arith.constant 0 : index
    %c0_0 = arith.constant 0 : index
    %0 = vector.load %arg1[%c0, %c0_0] : memref<64x32xf32, #tpu.memory_space<vmem>>, vector<64x32xf32>
    %1 = arith.truncf %0 : vector<64x32xf32> to vector<64x32xbf16>
    %c0_1 = arith.constant 0 : index
    %c0_2 = arith.constant 0 : index
    %2 = vector.load %arg2[%c0_1, %c0_2] : memref<32x384xbf16, #tpu.memory_space<vmem>>, vector<32x384xbf16>
    %cst = arith.constant dense<0.000000e+00> : vector<64x384xf32>
    %3 = tpu.matmul %1, %2, %cst {dimension_numbers = #tpu.dot_dimension_numbers<[1], [0], [0], [1], [0, 0, 1, 1], [], []>} : vector<64x32xbf16>, vector<32x384xbf16>, vector<64x384xf32> -> vector<64x384xf32>
    %c0_3 = arith.constant 0 : index
    %c0_4 = arith.constant 0 : index
    %4 = vector.load %arg3[%c0_3, %c0_4] : memref<1x384xf32, #tpu.memory_space<vmem>>, vector<1x384xf32>
    %5 = vector.broadcast %4 : vector<1x384xf32> to vector<64x384xf32>
    %6 = arith.addf %3, %5 : vector<64x384xf32>
    %7 = vector.extract_strided_slice %6 {offsets = [0, 0], sizes = [64, 128], strides = [1, 1]} : vector<64x384xf32> to vector<64x128xf32>
    %8 = vector.extract_strided_slice %6 {offsets = [0, 128], sizes = [64, 128], strides = [1, 1]} : vector<64x384xf32> to vector<64x128xf32>
    %9 = vector.extract_strided_slice %6 {offsets = [0, 256], sizes = [64, 128], strides = [1, 1]} : vector<64x384xf32> to vector<64x128xf32>
    %10 = arith.mulf %7, %8 : vector<64x128xf32>
    %c0_5 = arith.constant 0 : index
    %c0_6 = arith.constant 0 : index
    %11 = vector.load %arg4[%c0_5, %c0_6] : memref<128x16xf32, #tpu.memory_space<vmem>>, vector<128x16xf32>
    %cst_7 = arith.constant dense<0.000000e+00> : vector<64x16xf32>
    %12 = tpu.matmul %10, %11, %cst_7 {dimension_numbers = #tpu.dot_dimension_numbers<[1], [0], [0], [1], [0, 0, 1, 1], [], []>} : vector<64x128xf32>, vector<128x16xf32>, vector<64x16xf32> -> vector<64x16xf32>
    %c0_8 = arith.constant 0 : index
    %c0_9 = arith.constant 0 : index
    %13 = vector.load %arg5[%c0_8, %c0_9] : memref<16x128xf32, #tpu.memory_space<vmem>>, vector<16x128xf32>
    %cst_10 = arith.constant dense<0.000000e+00> : vector<64x128xf32>
    %14 = tpu.matmul %12, %13, %cst_10 {dimension_numbers = #tpu.dot_dimension_numbers<[1], [0], [0], [1], [0, 0, 1, 1], [], []>} : vector<64x16xf32>, vector<16x128xf32>, vector<64x128xf32> -> vector<64x128xf32>
    %15 = arith.mulf %14, %9 : vector<64x128xf32>
    %c0_11 = arith.constant 0 : index
    %c0_12 = arith.constant 0 : index
    %16 = vector.load %arg6[%c0_11, %c0_12] : memref<128x32xf32, #tpu.memory_space<vmem>>, vector<128x32xf32>
    %cst_13 = arith.constant dense<0.000000e+00> : vector<64x32xf32>
    %17 = tpu.matmul %15, %16, %cst_13 {dimension_numbers = #tpu.dot_dimension_numbers<[1], [0], [0], [1], [0, 0, 1, 1], [], []>} : vector<64x128xf32>, vector<128x32xf32>, vector<64x32xf32> -> vector<64x32xf32>
    %c0_14 = arith.constant 0 : index
    %c0_15 = arith.constant 0 : index
    %18 = vector.load %arg7[%c0_14, %c0_15] : memref<64x32xf32, #tpu.memory_space<vmem>>, vector<64x32xf32>
    tpu.vector_store %arg7[%c0_14, %c0_15], %17 {strides = array<i32>} : memref<64x32xf32, #tpu.memory_space<vmem>>, vector<64x32xf32>,
    return
  }
  func.func @transform_0(%arg0: i32) -> (i32, i32) {
    %c0_i32 = arith.constant 0 : i32
    %c0_i32_0 = arith.constant 0 : i32
    return %arg0, %c0_i32 : i32, i32
  }
  func.func @transform_1(%arg0: i32) -> (i32, i32) {
    %c0_i32 = arith.constant 0 : i32
    %c0_i32_0 = arith.constant 0 : i32
    %c0_i32_1 = arith.constant 0 : i32
    return %c0_i32, %c0_i32_0 : i32, i32
  }
  func.func @transform_2(%arg0: i32) -> (i32, i32) {
    %c0_i32 = arith.constant 0 : i32
    %c0_i32_0 = arith.constant 0 : i32
    %c0_i32_1 = arith.constant 0 : i32
    return %c0_i32, %c0_i32_0 : i32, i32
  }
  func.func @transform_3(%arg0: i32) -> (i32, i32) {
    %c0_i32 = arith.constant 0 : i32
    %c0_i32_0 = arith.constant 0 : i32
    %c0_i32_1 = arith.constant 0 : i32
    return %c0_i32, %c0_i32_0 : i32, i32
  }
  func.func @transform_4(%arg0: i32) -> (i32, i32) {
    %c0_i32 = arith.constant 0 : i32
    %c0_i32_0 = arith.constant 0 : i32
    %c0_i32_1 = arith.constant 0 : i32
    return %c0_i32, %c0_i32_0 : i32, i32
  }
  func.func @transform_5(%arg0: i32) -> (i32, i32) {
    %c0_i32 = arith.constant 0 : i32
    %c0_i32_0 = arith.constant 0 : i32
    %c0_i32_1 = arith.constant 0 : i32
    return %c0_i32, %c0_i32_0 : i32, i32
  }
  func.func @transform_6(%arg0: i32) -> (i32, i32) {
    %c0_i32 = arith.constant 0 : i32
    %c0_i32_0 = arith.constant 0 : i32
    return %arg0, %c0_i32 : i32, i32
  }
}

</mosaic_0001>

<bundles_post_ra>
// kernel: tpu_custom_call.1
= control target key start
LH: loop header
LB: loop body
LE: loop exit
PB: predicated region body
PF: predicated region fallthrough
CT: control target
= control target key end

     0   :  { %s1272_s21 = smov 0   ;;  %s1484_s0 = inlined_call_operand.vmem [shape: f32[128,32], index: 0, kind: input, shape index: {}]   ;;  %s1485_s1 = inlined_call_operand.vmem [shape: bf16[32,384], index: 1, kind: input, shape index: {}]   ;;  %s1486_s2 = inlined_call_operand.vmem [shape: f32[1,384], index: 2, kind: input, shape index: {}]   ;;  %s1487_s3 = inlined_call_operand.vmem [shape: f32[128,16], index: 3, kind: input, shape index: {}]   ;;  %s1488_s4 = inlined_call_operand.vmem [shape: f32[16,128], index: 4, kind: input, shape index: {}]   ;;  %s1489_s5 = inlined_call_operand.vmem [shape: f32[128,32], index: 5, kind: input, shape index: {}]   ;;  %s1490_s6 = inlined_call_operand.vmem [shape: f32[128,32], index: 6, kind: output, shape index: {}]  }
   0x1 LB: > { %s930_s22 = sadd.s32 4294967295, %s1234_s21   ;;  %p934_p0 = scmp.ge.s32.totalorder %s1234_s21, 1  ;;  %s1234_s21 = sphi %s1272_s21, %s16_s21  }
   0x2   : > { %p213_p1 = scmp.lt.s32.totalorder %s1234_s21, 3 }
   0x4   : > { %p214_p2 = pnand %p934_p0, %p213_p1 }
   0x5   : > { %v1220_v0 = vld [vmem:[%s1485_s1 + $0x4] ss:$12 sps:$4 sm:$0xff] (!%p214_p2)   ;;  %s935_s25 = sshll.u32 (!%p214_p2), %s930_s22, 3  ;;  %v1222_v1 = vld [vmem:[%s1485_s1] ss:$12 sps:$4 sm:$0xff] (!%p214_p2)   ;;  %v1236_v2 = vmov (!%p214_p2), 0   ;;  %v278_v46 = vlaneseq (!%p214_p2) }
   0x6   : > { %217 = sbr.rel (%p214_p2) target bundleno = 906 (0x38a), region = 44  ;;  %370 = vmatprep.mubr.bf16.mxu0 (!%p214_p2), %v1236_v2  ;;  %p244_p3 = scmp.lt.s32.totalorder (!%p214_p2), %s935_s25, 15  ;;  %338 = vmatprep.subr.bf16.mxu0 (!%p214_p2), %v1220_v0  ;;  %v1223_v3 = vld [vmem:[%s1485_s1 + $0x1c] ss:$12 sps:$4 sm:$0xff] (!%p214_p2)   ;;  %v484_v4 = vld [vmem:[%s1487_s3] sm:$0xff] (!%p214_p2)  ;;  %v486_v8 = vld [vmem:[%s1487_s3 + $0x10] sm:$0xff] (!%p214_p2) }
   0x7   : > { %339 = vmatpush1.bf16.msra.mxu0 (!%p214_p2), %v1222_v1  ;;  %v1225_v5 = vld [vmem:[%s1485_s1 + $0x18] ss:$12 sps:$4 sm:$0xff] (!%p214_p2)   ;;  %v485_v6 = vld [vmem:[%s1487_s3 + $0x8] sm:$0xff] (!%p214_p2)  ;;  %vm325_vm0 = vcmask (!%p214_p2), 261120   ;;  %v490_v19 = vld [vmem:[%s1487_s3 + $0x30] sm:$0xff] (!%p214_p2)  ;;  %v1378_v47 = vshrl.u32 (!%p214_p2), %v278_v46, 7 }
   0x8   : > { %340 = vmatprep.subr.bf16.mxu0 (!%p214_p2), %v1223_v3  ;;  %v1143_v7 = vpack.c.bf16 (!%p214_p2), %v485_v6, %v484_v4  ;;  %v487_v9 = vld [vmem:[%s1487_s3 + $0x18] sm:$0xff] (!%p214_p2)  ;;  %v488_v14 = vld [vmem:[%s1487_s3 + $0x20] sm:$0xff] (!%p214_p2)  ;;  %v489_v15 = vld [vmem:[%s1487_s3 + $0x28] sm:$0xff] (!%p214_p2)  ;;  %vm607_vm1 = vcmask (!%p214_p2), 130048  }
   0x9   : > { %v1147_v13 = vpack.c.bf16 (!%p214_p2), %v487_v9, %v486_v8  ;;  %v1151_v18 = vpack.c.bf16 (!%p214_p2), %v489_v15, %v488_v14  ;;  %v491_v20 = vld [vmem:[%s1487_s3 + $0x38] sm:$0xff] (!%p214_p2)  ;;  %v492_v23 = vld [vmem:[%s1487_s3 + $0x40] sm:$0xff] (!%p214_p2)  ;;  %v493_v24 = vld [vmem:[%s1487_s3 + $0x48] sm:$0xff] (!%p214_p2)  ;;  %v280_v48 = vsub.s32 (!%p214_p2), 0, %v1378_v47  ;;  %v284_v50 = vsub.s32 (!%p214_p2), 1, %v1378_v47 }
   0xa   : > { %v1155_v22 = vpack.c.bf16 (!%p214_p2), %v491_v20, %v490_v19  ;;  %v1159_v27 = vpack.c.bf16 (!%p214_p2), %v493_v24, %v492_v23  ;;  %v494_v28 = vld [vmem:[%s1487_s3 + $0x50] sm:$0xff] (!%p214_p2)  ;;  %v495_v29 = vld [vmem:[%s1487_s3 + $0x58] sm:$0xff] (!%p214_p2)  ;;  %v496_v35 = vld [vmem:[%s1487_s3 + $0x60] sm:$0xff] (!%p214_p2) }
   0xb   : > { %341 = vmatpush1.bf16.msra.mxu0 (!%p214_p2), %v1225_v5  ;;  %v1163_v31 = vpack.c.bf16 (!%p214_p2), %v495_v29, %v494_v28  ;;  %v497_v36 = vld [vmem:[%s1487_s3 + $0x68] sm:$0xff] (!%p214_p2)  ;;  %v498_v38 = vld [vmem:[%s1487_s3 + $0x70] sm:$0xff] (!%p214_p2)  ;;  %v499_v39 = vld [vmem:[%s1487_s3 + $0x78] sm:$0xff] (!%p214_p2) }
   0xc   : > { %1144 = vmatprep.subr.bf16.mxu0 (!%p214_p2), %v1143_v7  ;;  %v1167_v37 = vpack.c.bf16 (!%p214_p2), %v497_v36, %v496_v35  ;;  %v1171_v40 = vpack.c.bf16 (!%p214_p2), %v499_v39, %v498_v38  ;;  %v1226_v41 = vld [vmem:[%s1485_s1 + $0x8] ss:$12 sps:$4 sm:$0xff] (!%p214_p2)   ;;  %v1227_v42 = vld [vmem:[%s1485_s1 + $0x20] ss:$12 sps:$4 sm:$0xff] (!%p214_p2)  }
   0xd   : > { %s1492_s25 = smov (!%p244_p3, %s935_s25), 15  ;;  %v605_v43 = vld [vmem:[%s1488_s4] sm:$0xff]  ;;  %v606_v44 = vld [vmem:[%s1488_s4 + $0x8] sm:$0xff]  ;;  %1027 = vmatprep.subr.bf16.mxu1 %v1226_v41 }
   0xe   : > { %s936_s12 = sshll.u32 %s1492_s25, 3  ;;  %1028 = vmatpush3.bf16.msra.mxu1 %v1226_v41  ;;  %v1175_v45 = vpack.c.bf16 %v606_v44, %v605_v43  ;;  %v1384_v49 = vld [vmem:[%s1486_s2] sm:$0x7]  ;;  %v748_v41 = vld [vmem:[%s1489_s5 + $0x18] sm:$0xff]  ;;  %v750_v46 = vld [vmem:[%s1489_s5 + $0x28] sm:$0xff] }
   0xf   : > { %s1312_s19 = scalar_lea.vmem %s1484_s0, %s936_s12  ;;  %1029 = vmatprep.subr.bf16.mxu1 %v1227_v42  ;;  %v281_v51 = vrot.slane %v1384_v49, %v280_v48  ;;  %v285_v52 = vrot.slane %v1384_v49, %v284_v50  ;;  %v745_v29 = vld [vmem:[%s1489_s5] sm:$0xff]  ;;  %v751_v50 = vld [vmem:[%s1489_s5 + $0x30] sm:$0xff]  ;;  %s253_s27 = scalar_lea.vmem %s1490_s6, %s936_s12 }
  0x10   : > { %v256_v10 = vld [vmem:[%s1312_s19] sm:$0xff]  ;;  %v257_v11 = vld [vmem:[%s1312_s19 + $0x8] sm:$0xff]  ;;  %v258_v16 = vld [vmem:[%s1312_s19 + $0x10] sm:$0xff] }
  0x11   : > { %v264_v12 = vpack.c.bf16 %v257_v11, %v256_v10  ;;  %v259_v17 = vld [vmem:[%s1312_s19 + $0x18] sm:$0xff]  ;;  %v260_v25 = vld [vmem:[%s1312_s19 + $0x20] sm:$0xff]  ;;  %v261_v26 = vld [vmem:[%s1312_s19 + $0x28] sm:$0xff] }
  0x12   : > { %v265_v21 = vpack.c.bf16 %v259_v17, %v258_v16  ;;  %v266_v30 = vpack.c.bf16 %v261_v26, %v260_v25  ;;  %v262_v32 = vld [vmem:[%s1312_s19 + $0x30] sm:$0xff]  ;;  %v263_v33 = vld [vmem:[%s1312_s19 + $0x38] sm:$0xff]  ;;  %1030 = vmatpush3.bf16.msra.mxu1 %v1227_v42 }
  0x13   : > { %945 = vmatmul.mubr.msk.bf16.vlgmr.msra.gmra.mrb[0].mxu0 %vm325_vm0, %v264_v12  ;;  %1031 = vmatprep.mubr.msk.bf16.mxu1 %vm325_vm0, %v264_v12  ;;  %v267_v34 = vpack.c.bf16 %v263_v33, %v262_v32 }
  0x14   : > { %380 = vmatprep.mubr.bf16.mxu0 %v1236_v2  ;;  %1146 = vmatpush3.bf16.msra.mxu0 %v1143_v7 }
  0x15   : > { %1148 = vmatprep.subr.bf16.mxu0 %v1147_v13  ;;  %1176 = vmatprep.subr.bf16.mxu1 %v1175_v45 }
  0x16   : > { %1032 = vmatmul.mubr.msk.bf16.vlgmr.msra.gmra.mrb[0].mxu1 %vm325_vm0, %v265_v21 }
  0x17   : > { %1035 = vmatprep.mubr.msk.bf16.mxu1 %vm325_vm0, %v266_v30  ;;  %1178 = vmatpush3.bf16.msra.mxu1 %v1175_v45  ;;  %v749_v45 = vld [vmem:[%s1489_s5 + $0x20] sm:$0xff] }
  0x18   : > { %1150 = vmatpush3.bf16.msra.mxu0 %v1147_v13  ;;  %v1187_v48 = vpack.c.bf16 %v750_v46, %v749_v45 }
  0x19   : > { %1152 = vmatprep.subr.bf16.mxu0 %v1151_v18 }
  0x1b   : > { %946 = vmatmul.mubr.msk.bf16.gmra.mrb[4].mxu0 %vm325_vm0, %v265_v21 }
  0x1c   : > { %390 = vmatprep.mubr.bf16.mxu0 %v1236_v2  ;;  %1154 = vmatpush3.bf16.msra.mxu0 %v1151_v18 }
  0x1d   : > { %1156 = vmatprep.subr.bf16.mxu0 %v1155_v22 }
  0x1e   : > { %1036 = vmatmul.mubr.msk.bf16.gmra.mrb[4].mxu1 %vm325_vm0, %v267_v34 }
  0x20   : > { %1158 = vmatpush3.bf16.msra.mxu0 %v1155_v22 }
  0x21   : > { %1160 = vmatprep.subr.bf16.mxu0 %v1159_v27 }
  0x23   : > { %947 = vmatmul.mubr.msk.bf16.gmra.mrb[8].mxu0 %vm325_vm0, %v266_v30  ;;  %v746_v30 = vld [vmem:[%s1489_s5 + $0x8] sm:$0xff] }
  0x24   : > { %400 = vmatprep.mubr.bf16.mxu0 %v1236_v2  ;;  %1162 = vmatpush3.bf16.msra.mxu0 %v1159_v27 }
  0x25   : > { %1164 = vmatprep.subr.bf16.mxu0 %v1163_v31 }
  0x28   : > { %1166 = vmatpush3.bf16.msra.mxu0 %v1163_v31  ;;  %v1179_v31 = vpack.c.bf16 %v746_v30, %v745_v29 }
  0x29   : > { %1168 = vmatprep.subr.bf16.mxu0 %v1167_v37 }
  0x2a   : > { %1180 = vmatprep.subr.bf16.mxu1 %v1179_v31 }
  0x2b   : > { %948 = vmatmul.mubr.msk.bf16.gmra.mrb[12].mxu0 %vm325_vm0, %v267_v34 }
  0x2c   : > { %1170 = vmatpush3.bf16.msra.mxu0 %v1167_v37 }
  0x2d   : > { %1172 = vmatprep.subr.bf16.mxu0 %v1171_v40 }
  0x30   : > { %1174 = vmatpush3.bf16.msra.mxu0 %v1171_v40  ;;  %v747_v40 = vld [vmem:[%s1489_s5 + $0x10] sm:$0xff] }
  0x31   : > { %v1183_v44 = vpack.c.bf16 %v748_v41, %v747_v40 }
  0xe6   : > { %v372_v53 = vpop.f32.mrb[0].mxu0 }
  0xe7   : > { %v373_v54 = vadd.f32 %v372_v53, %v281_v51  ;;  %v374_v55 = vpop.f32.mrb[1].mxu0 }
  0xe8   : > { %v375_v56 = vadd.f32 %v374_v55, %v285_v52  ;;  %v376_v57 = vpop.f32.mrb[2].mxu0  ;;  %v753_v55 = vld [vmem:[%s1489_s5 + $0x40] sm:$0xff] }
  0xe9   : > { %v377_v58 = vadd.f32 %v376_v57, %v281_v51  ;;  %v378_v59 = vpop.f32.mrb[3].mxu0  ;;  %v1395_v32 = vpop.f32.mrb[0].mxu1 }
  0xea   : > { %v476_v60 = vmul.f32 %v375_v56, %v373_v54  ;;  %v379_v61 = vadd.f32 %v378_v59, %v285_v52  ;;  %v1397_v33 = vpop.f32.mrb[1].mxu1  ;;  %v754_v56 = vld [vmem:[%s1489_s5 + $0x48] sm:$0xff]  ;;  %v756_v59 = vld [vmem:[%s1489_s5 + $0x58] sm:$0xff] }
  0xeb   : > { %v1399_v34 = vpop.f32.mrb[2].mxu1  ;;  %v1195_v57 = vpack.c.bf16 %v754_v56, %v753_v55 }
  0xec   : > { %v477_v62 = vmul.f32 %v379_v61, %v377_v58  ;;  %1071 = vmatprep.mubr.f32.mxu0 %v476_v60  ;;  %v448_v35 = vpop.f32.mrb[3].mxu1  ;;  %v755_v58 = vld [vmem:[%s1489_s5 + $0x50] sm:$0xff] }
  0xee   : > { %v382_v63 = vpop.f32.mrb[4].mxu0  ;;  %1072 = vmatmul.mubr.f32.vlgmr.msra.gmra.mrb[16].mxu0 %v477_v62  ;;  %v1199_v62 = vpack.c.bf16 %v756_v59, %v755_v58 }
  0xef   : > { %v383_v0 = vadd.f32 %v382_v63, %v281_v51  ;;  %v384_v1 = vpop.f32.mrb[5].mxu0  ;;  %v757_v63 = vld [vmem:[%s1489_s5 + $0x60] sm:$0xff] }
  0xf0   : > { %v385_v2 = vadd.f32 %v384_v1, %v285_v52  ;;  %v386_v3 = vpop.f32.mrb[6].mxu0 }
  0xf1   : > { %v387_v4 = vadd.f32 %v386_v3, %v281_v51  ;;  %v388_v5 = vpop.f32.mrb[7].mxu0  ;;  %v1401_v36 = vpop.f32.mrb[4].mxu1 }
  0xf2   : > { %v478_v6 = vmul.f32 %v385_v2, %v383_v0  ;;  %v389_v7 = vadd.f32 %v388_v5, %v285_v52  ;;  %v1403_v37 = vpop.f32.mrb[5].mxu1  ;;  %v758_v0 = vld [vmem:[%s1489_s5 + $0x68] sm:$0xff]  ;;  %v760_v5 = vld [vmem:[%s1489_s5 + $0x78] sm:$0xff] }
  0xf3   : > { %v1405_v38 = vpop.f32.mrb[6].mxu1  ;;  %v1203_v1 = vpack.c.bf16 %v758_v0, %v757_v63 }
  0xf4   : > { %v479_v8 = vmul.f32 %v389_v7, %v387_v4  ;;  %1074 = vmatprep.mubr.f32.mxu0 %v478_v6  ;;  %v1407_v39 = vpop.f32.mrb[7].mxu1  ;;  %v759_v4 = vld [vmem:[%s1489_s5 + $0x70] sm:$0xff]  ;;  %v288_v7 = vsub.s32 2, %v1378_v47 }
  0xf5   : > { %v1207_v6 = vpack.c.bf16 %v760_v5, %v759_v4 }
  0xf6   : > { %v392_v9 = vpop.f32.mrb[8].mxu0  ;;  %1075 = vmatmul.mubr.f32.gmra.mrb[18].mxu0 %v479_v8  ;;  %v289_v8 = vrot.slane %v1384_v49, %v288_v7 }
  0xf7   : > { %v393_v10 = vadd.f32 %v392_v9, %v281_v51  ;;  %v394_v11 = vpop.f32.mrb[9].mxu0 }
  0xf8   : > { %v395_v12 = vadd.f32 %v394_v11, %v285_v52  ;;  %v396_v13 = vpop.f32.mrb[10].mxu0  ;;  %v449_v9 = vadd.f32 %v448_v35, %v289_v8  ;;  %v465_v47 = vadd.f32 %v1407_v39, %v289_v8  ;;  %v462_v49 = vadd.f32 %v1403_v37, %v289_v8 }
  0xf9   : > { %v397_v14 = vadd.f32 %v396_v13, %v281_v51  ;;  %v398_v15 = vpop.f32.mrb[11].mxu0 }
  0xfa   : > { %v480_v16 = vmul.f32 %v395_v12, %v393_v10  ;;  %v399_v17 = vadd.f32 %v398_v15, %v285_v52  ;;  %v446_v10 = vadd.f32 %v1397_v33, %v289_v8  ;;  %v457_v15 = vadd.f32 %v1399_v34, %v289_v8 }
  0xfc   : > { %v481_v18 = vmul.f32 %v399_v17, %v397_v14  ;;  %1077 = vmatprep.mubr.f32.mxu0 %v480_v16  ;;  %v454_v16 = vadd.f32 %v1395_v32, %v289_v8 }
  0xfe   : > { %v402_v19 = vpop.f32.mrb[12].mxu0  ;;  %1078 = vmatmul.mubr.f32.gmra.mrb[20].mxu0 %v481_v18 }
  0xff   : > { %v403_v20 = vadd.f32 %v402_v19, %v281_v51  ;;  %v404_v21 = vpop.f32.mrb[13].mxu0 }
 0x100   : > { %v405_v22 = vadd.f32 %v404_v21, %v285_v52  ;;  %v406_v23 = vpop.f32.mrb[14].mxu0 }
 0x101   : > { %v407_v24 = vadd.f32 %v406_v23, %v281_v51  ;;  %v408_v25 = vpop.f32.mrb[15].mxu0  ;;  %v752_v51 = vld [vmem:[%s1489_s5 + $0x38] sm:$0xff] }
 0x102   : > { %v482_v26 = vmul.f32 %v405_v22, %v403_v20  ;;  %v409_v27 = vadd.f32 %v408_v25, %v285_v52  ;;  %v1191_v54 = vpack.c.bf16 %v752_v51, %v751_v50  ;;  %v473_v25 = vadd.f32 %v1405_v38, %v289_v8 }
 0x104   : > { %v483_v28 = vmul.f32 %v409_v27, %v407_v24  ;;  %1080 = vmatprep.mubr.f32.mxu0 %v482_v26  ;;  %v470_v26 = vadd.f32 %v1401_v36, %v289_v8 }
 0x106   : > { %1081 = vmatmul.mubr.f32.gmra.mrb[22].mxu0 %v483_v28 }
 0x1c1   : > { %v1073_v42 = vpop.f32.mrb[16].mxu0 }
 0x1c2   : > { %v566_v43 = vpop.f32.mrb[17].mxu0 }
 0x1c3   : > { %1087 = vmatprep.mubr.msk.f32.mxu1 %vm607_vm1, %v566_v43 }
 0x1c4   : > { %1088 = vmatmul.mubr.msk.f32.vlgmr.msra.gmra.mrb[8].mxu1 %vm607_vm1, %v1073_v42 }
 0x1c5   : > { %1182 = vmatpush3.bf16.msra.mxu1 %v1179_v31 }
 0x1c6   : > { %1184 = vmatprep.subr.bf16.mxu1 %v1183_v44 }
 0x1c9   : > { %v1076_v52 = vpop.f32.mrb[18].mxu0  ;;  %1186 = vmatpush3.bf16.msra.mxu1 %v1183_v44 }
 0x1ca   : > { %v576_v53 = vpop.f32.mrb[19].mxu0  ;;  %1188 = vmatprep.subr.bf16.mxu1 %v1187_v48 }
 0x1cb   : > { %1090 = vmatprep.mubr.msk.f32.mxu1 %vm607_vm1, %v576_v53 }
 0x1cc   : > { %1091 = vmatmul.mubr.msk.f32.gmra.mrb[10].mxu1 %vm607_vm1, %v1076_v52 }
 0x1cd   : > { %1190 = vmatpush3.bf16.msra.mxu1 %v1187_v48 }
 0x1ce   : > { %1192 = vmatprep.subr.bf16.mxu1 %v1191_v54 }
 0x1d1   : > { %v1079_v60 = vpop.f32.mrb[20].mxu0  ;;  %1194 = vmatpush3.bf16.msra.mxu1 %v1191_v54 }
 0x1d2   : > { %v586_v61 = vpop.f32.mrb[21].mxu0  ;;  %1196 = vmatprep.subr.bf16.mxu1 %v1195_v57 }
 0x1d3   : > { %1093 = vmatprep.mubr.msk.f32.mxu1 %vm607_vm1, %v586_v61 }
 0x1d4   : > { %1094 = vmatmul.mubr.msk.f32.gmra.mrb[12].mxu1 %vm607_vm1, %v1079_v60 }
 0x1d5   : > { %1198 = vmatpush3.bf16.msra.mxu1 %v1195_v57 }
 0x1d6   : > { %1200 = vmatprep.subr.bf16.mxu1 %v1199_v62 }
 0x1d9   : > { %v1082_v2 = vpop.f32.mrb[22].mxu0  ;;  %1202 = vmatpush3.bf16.msra.mxu1 %v1199_v62 }
 0x1da   : > { %v596_v3 = vpop.f32.mrb[23].mxu0  ;;  %1204 = vmatprep.subr.bf16.mxu1 %v1203_v1 }
 0x1db   : > { %1096 = vmatprep.mubr.msk.f32.mxu1 %vm607_vm1, %v596_v3 }
 0x1dc   : > { %1097 = vmatmul.mubr.msk.f32.gmra.mrb[14].mxu1 %vm607_vm1, %v1082_v2 }
 0x1dd   : > { %1206 = vmatpush3.bf16.msra.mxu1 %v1203_v1 }
 0x1de   : > { %1208 = vmatprep.subr.bf16.mxu1 %v1207_v6 }
 0x1e1   : > { %1210 = vmatpush3.bf16.msra.mxu1 %v1207_v6 }
 0x297   : > { %v1089_v11 = vpop.f32.mrb[8].mxu1 }
 0x298   : > { %v738_v12 = vmul.f32 %v1089_v11, %v449_v9  ;;  %v698_v13 = vpop.f32.mrb[9].mxu1 }
 0x299   : > { %v737_v14 = vmul.f32 %v698_v13, %v446_v10 }
 0x29b   : > { %1131 = vmatprep.mubr.f32.mxu1 %v737_v14 }
 0x29c   : > { %1132 = vmatmul.mubr.f32.vlgmr.msra.gmra.mrb[16].mxu1 %v738_v12 }
 0x29f   : > { %v1092_v17 = vpop.f32.mrb[10].mxu1 }
 0x2a0   : > { %v740_v18 = vmul.f32 %v1092_v17, %v457_v15  ;;  %v708_v19 = vpop.f32.mrb[11].mxu1 }
 0x2a1   : > { %v739_v20 = vmul.f32 %v708_v19, %v454_v16 }
 0x2a3   : > { %1134 = vmatprep.mubr.f32.mxu1 %v739_v20 }
 0x2a4   : > { %1135 = vmatmul.mubr.f32.gmra.mrb[18].mxu1 %v740_v18 }
 0x2a7   : > { %v1095_v21 = vpop.f32.mrb[12].mxu1 }
 0x2a8   : > { %v742_v22 = vmul.f32 %v1095_v21, %v465_v47  ;;  %v718_v23 = vpop.f32.mrb[13].mxu1 }
 0x2a9   : > { %v741_v24 = vmul.f32 %v718_v23, %v462_v49 }
 0x2ab   : > { %1137 = vmatprep.mubr.f32.mxu1 %v741_v24 }
 0x2ac   : > { %1138 = vmatmul.mubr.f32.gmra.mrb[20].mxu1 %v742_v22 }
 0x2af   : > { %v1098_v27 = vpop.f32.mrb[14].mxu1 }
 0x2b0   : > { %v744_v28 = vmul.f32 %v1098_v27, %v473_v25  ;;  %v728_v29 = vpop.f32.mrb[15].mxu1 }
 0x2b1   : > { %v743_v30 = vmul.f32 %v728_v29, %v470_v26 }
 0x2b3   : > { %1140 = vmatprep.mubr.f32.mxu1 %v743_v30 }
 0x2b4   : > { %1141 = vmatmul.mubr.f32.gmra.mrb[22].mxu1 %v744_v28 }
 0x36f   : > { %v1133_v31 = vpop.f32.mrb[16].mxu1 }
 0x370   : > { %867 = vst.msk [vmem:[%s253_s27 + $0x8] sm:$0xff] %vm325_vm0, %v1133_v31  ;;  %v827_v32 = vpop.f32.mrb[17].mxu1 }
 0x371   : > { %866 = vst.msk [vmem:[%s253_s27] sm:$0xff] %vm325_vm0, %v827_v32 }
 0x377   : > { %v1136_v33 = vpop.f32.mrb[18].mxu1 }
 0x378   : > { %869 = vst.msk [vmem:[%s253_s27 + $0x18] sm:$0xff] %vm325_vm0, %v1136_v33  ;;  %v837_v34 = vpop.f32.mrb[19].mxu1 }
 0x379   : > { %868 = vst.msk [vmem:[%s253_s27 + $0x10] sm:$0xff] %vm325_vm0, %v837_v34 }
 0x37f   : > { %v1139_v35 = vpop.f32.mrb[20].mxu1 }
 0x380   : > { %871 = vst.msk [vmem:[%s253_s27 + $0x28] sm:$0xff] %vm325_vm0, %v1139_v35  ;;  %v847_v36 = vpop.f32.mrb[21].mxu1 }
 0x381   : > { %870 = vst.msk [vmem:[%s253_s27 + $0x20] sm:$0xff] %vm325_vm0, %v847_v36 }
 0x387   : > { %v1142_v37 = vpop.f32.mrb[22].mxu1 }
 0x388   : > { %873 = vst.msk [vmem:[%s253_s27 + $0x38] sm:$0xff] %vm325_vm0, %v1142_v37  ;;  %v857_v38 = vpop.f32.mrb[23].mxu1 }
 0x389   : > { %872 = vst.msk [vmem:[%s253_s27 + $0x30] sm:$0xff] %vm325_vm0, %v857_v38 }
 0x38a PF: > { %s16_s21 = sadd.s32 1, %s1234_s21  }
 0x38b   : > { %p13_p4 = scmp.ge.s32.totalorder %s16_s21, 4  }
 0x38d   :  { %15 = sbr.rel (!%p13_p4) target bundleno = 1 (0x1), region = 74 }

</bundles_post_ra>
